<compile_context>
chip_gen: v6e
topology: v6e:2x2x1
jax: 0.10.0
libtpu: 0.0.40
codegen_flags: <defaults>
</compile_context>

<pallas_src>
import jax
import jax.numpy as jnp
from jax.experimental import pallas as pl
from jax.experimental.pallas import tpu as pltpu


def _ftanh_kernel(x_ref, o_ref):
    x = x_ref[...]
    xf = x.astype(jnp.float32)
    # sigmoid(2x) = 1 / (1 + exp(-2x)); exact divide keeps bit-parity with ref.
    s = 1.0 / (1.0 + jnp.exp(-2.0 * xf))
    ind = jnp.where(xf < 0.0, 0.0, 1.0)
    # a = -2s ; b = 2 - 2s  ==>  res = 2 * (indicator(x >= 0) - s)
    o_ref[...] = (2.0 * (ind - s)).astype(o_ref.dtype)


# Widest-useful-first lane candidates (all multiples of 128 -> unmasked vst);
# >512 lanes gives no further store-slot benefit and starves the grid of blocks.
_LANE_CANDIDATES = (512, 256, 128)
# Target block count so the v7x megacore (2 TCs) has work to shard and balance.
_MIN_GRID_BLOCKS = 8


def _budget():
    """Per-block byte budget and explicit VMEM limit, generation aware."""
    block_bytes = 4 << 20          # v6e/v7x class tile (~4 MiB)
    vmem_limit = 32 << 20
    try:
        cap = pltpu.get_tpu_info().vmem_capacity_bytes
        vmem_limit = min(vmem_limit, cap // 2)       # never > half physical VMEM (v7x: 64 MiB)
        block_bytes = min(block_bytes, vmem_limit // 6)
    except Exception:
        # Not on TPU / interpret mode: conservative defaults.
        block_bytes, vmem_limit = 2 << 20, 16 << 20
    return int(block_bytes), int(vmem_limit)


def _pick_tile(dim, budget_elems, align, min_blocks=_MIN_GRID_BLOCKS):
    """Block size along `dim`: multiple of `align` (or full dim), within the
    element budget, and small enough to yield >= min_blocks blocks when the
    dim allows it (megacore sharding)."""
    if dim <= align:
        return dim                                   # full-dim block (exempt from alignment)
    cap = max(align, (min(budget_elems, dim) // align) * align)
    want = -(-dim // min_blocks)                     # ceil(dim / min_blocks)
    want = max(align, (want // align) * align)
    return min(cap, want)


def ftanh(x):
    """Elementwise FTanh. Accepts any shape / float dtype."""
    orig_shape = x.shape
    orig_dtype = x.dtype
    n = x.size
    if n == 0:
        return x

    itemsize = jnp.dtype(orig_dtype).itemsize
    pack = max(8, 32 // itemsize)        # sublane packing: f32 -> 8, bf16 -> 16, int8/fp8 -> 32
    block_bytes, vmem_limit = _budget()

    if n % 128 == 0:
        # Lane-dense fast path: free reshape of the flat buffer to (rows, lane).
        lane = next(c for c in _LANE_CANDIDATES if n % c == 0)
        rows, cols = n // lane, lane
        x2d = jnp.ravel(x).reshape(rows, cols)
        tile_cols = cols
        tile_rows = _pick_tile(rows, max(1, block_bytes // (tile_cols * itemsize)), pack)
    else:
        # Ragged path: no pad/concat, no slice-back. Process in the natural
        # (collapsed-leading, last-dim) layout; trailing partial blocks are
        # masked by Pallas. TODO(synk): lane-dense repack of ragged inputs via
        # an in-kernel masked tail store.
        cols = orig_shape[-1] if x.ndim >= 1 else 1
        cols = max(int(cols), 1)
        rows = n // cols
        x2d = x.reshape(rows, cols)
        rows_min_block = rows if rows <= pack else pack
        col_budget = max(1, block_bytes // (rows_min_block * itemsize))
        if cols <= 128 or cols <= col_budget:
            tile_cols = cols                                   # full last dim (exempt)
        else:
            tile_cols = max(128, (col_budget // 128) * 128)    # multiple of 128; last block masked
        tile_rows = _pick_tile(rows, max(1, block_bytes // (tile_cols * itemsize)), pack)

    grid = (pl.cdiv(rows, tile_rows), pl.cdiv(cols, tile_cols))
    tile_bytes = tile_rows * tile_cols * itemsize
    vmem_limit = int(max(vmem_limit, 6 * tile_bytes))          # 4 pipeline buffers + headroom

    cost = pl.CostEstimate(
        flops=6 * n,
        transcendentals=n,
        bytes_accessed=2 * n * itemsize,
    )

    out2d = pl.pallas_call(
        _ftanh_kernel,
        out_shape=jax.ShapeDtypeStruct((rows, cols), orig_dtype),
        grid_spec=pltpu.PrefetchScalarGridSpec(
            num_scalar_prefetch=0,
            grid=grid,
            in_specs=[pl.BlockSpec((tile_rows, tile_cols), lambda i, j: (i, j))],
            out_specs=pl.BlockSpec((tile_rows, tile_cols), lambda i, j: (i, j)),
        ),
        compiler_params=pltpu.CompilerParams(
            dimension_semantics=("parallel", "parallel"),
            vmem_limit_bytes=vmem_limit,
        ),
        cost_estimate=cost,
    )(x2d)

    return out2d.reshape(orig_shape)


def _ftanh_ref(x):
    # Pure-JAX reference mirroring the PyTorch forward.
    a = -2.0 / (1.0 + jnp.exp(-2.0 * x))
    b = 2.0 - 2.0 / (1.0 + jnp.exp(-2.0 * x))
    return jnp.where(x < 0, a, b)


if __name__ == "__main__":
    key = jax.random.PRNGKey(0)
    k1, k2, k3, k4 = jax.random.split(key, 4)

    # Main case: NCHW, element count divisible by 128 -> lane-dense fast path.
    x = jax.random.normal(k1, (2, 4, 16, 16), dtype=jnp.float32) * 3.0
    out = jax.block_until_ready(ftanh(x))
    ref = _ftanh_ref(x)
    assert out.shape == x.shape and out.dtype == x.dtype
    assert jnp.allclose(out, ref, atol=1e-5, rtol=1e-5), "mismatch (main case)"

    # Multi-block case: exercises the tiled grid (>= several blocks for megacore).
    x1 = jax.random.normal(k2, (2, 4, 64, 64), dtype=jnp.float32) * 3.0
    out1 = jax.block_until_ready(ftanh(x1))
    assert jnp.allclose(out1, _ftanh_ref(x1), atol=1e-5, rtol=1e-5), "mismatch (multi-block)"

    # Ragged case: element count not divisible by 128 -> natural-layout path
    # (no pad/concat, no slice-back).
    x2 = jax.random.normal(k3, (3, 5, 7, 11), dtype=jnp.float32) * 3.0
    out2 = jax.block_until_ready(ftanh(x2))
    ref2 = _ftanh_ref(x2)
    assert out2.shape == x2.shape and out2.dtype == x2.dtype
    assert jnp.allclose(out2, ref2, atol=1e-5, rtol=1e-5), "mismatch (ragged case)"

    # Half-precision case: exercises dtype-aware sublane packing (f32 math inside).
    x3 = (jax.random.normal(k4, (2, 4, 16, 16), dtype=jnp.float32) * 3.0).astype(jnp.bfloat16)
    out3 = jax.block_until_ready(ftanh(x3))
    ref3 = _ftanh_ref(x3.astype(jnp.float32)).astype(jnp.bfloat16)
    assert out3.shape == x3.shape and out3.dtype == x3.dtype
    assert jnp.allclose(out3.astype(jnp.float32), ref3.astype(jnp.float32),
                        atol=2e-2, rtol=2e-2), "mismatch (bf16 case)"

    print("KERNEL_OK")
</pallas_src>

<mosaic_0001>
module attributes {stable_mosaic.version = 11 : i64} {
  func.func @_ftanh_kernel(%arg0: i32, %arg1: i32, %arg2: memref<4x512xf32, #tpu.memory_space<vmem>>, %arg3: memref<4x512xf32, #tpu.memory_space<vmem>>) attributes {dimension_semantics = [#tpu.dimension_semantics<parallel>, #tpu.dimension_semantics<parallel>], iteration_bounds = array<i64: 1, 1>, scalar_prefetch = 0 : i64, scratch_operands = 0 : i64, tpu.core_type = #tpu.core_type<tc>, window_params = [{transform_indices = @transform_0, window_bounds = array<i64: 4, 512>}, {transform_indices = @transform_1, window_bounds = array<i64: 4, 512>}]} {
    %c0 = arith.constant 0 : index
    %c0_0 = arith.constant 0 : index
    %0 = vector.load %arg2[%c0, %c0_0] : memref<4x512xf32, #tpu.memory_space<vmem>>, vector<4x512xf32>
    %cst = arith.constant -2.000000e+00 : f32
    %1 = vector.broadcast %cst : f32 to vector<4x512xf32>
    %2 = arith.mulf %1, %0 : vector<4x512xf32>
    %3 = math.exp %2 : vector<4x512xf32>
    %cst_1 = arith.constant 1.000000e+00 : f32
    %4 = vector.broadcast %cst_1 : f32 to vector<4x512xf32>
    %5 = arith.addf %4, %3 : vector<4x512xf32>
    %cst_2 = arith.constant 1.000000e+00 : f32
    %6 = vector.broadcast %cst_2 : f32 to vector<4x512xf32>
    %7 = arith.divf %6, %5 : vector<4x512xf32>
    %cst_3 = arith.constant 0.000000e+00 : f32
    %8 = vector.broadcast %cst_3 : f32 to vector<4x512xf32>
    %9 = arith.cmpf olt, %0, %8 : vector<4x512xf32>
    %cst_4 = arith.constant 0.000000e+00 : f32
    %cst_5 = arith.constant 1.000000e+00 : f32
    %10 = vector.broadcast %cst_4 : f32 to vector<4x512xf32>
    %11 = vector.broadcast %cst_5 : f32 to vector<4x512xf32>
    %12 = arith.select %9, %10, %11 : vector<4x512xi1>, vector<4x512xf32>
    %13 = arith.subf %12, %7 : vector<4x512xf32>
    %cst_6 = arith.constant 2.000000e+00 : f32
    %14 = vector.broadcast %cst_6 : f32 to vector<4x512xf32>
    %15 = arith.mulf %14, %13 : vector<4x512xf32>
    %c0_7 = arith.constant 0 : index
    %c0_8 = arith.constant 0 : index
    %16 = vector.load %arg3[%c0_7, %c0_8] : memref<4x512xf32, #tpu.memory_space<vmem>>, vector<4x512xf32>
    tpu.vector_store %arg3[%c0_7, %c0_8], %15 {strides = array<i32>} : memref<4x512xf32, #tpu.memory_space<vmem>>, vector<4x512xf32>,
    return
  }
  func.func @transform_0(%arg0: i32, %arg1: i32) -> (i32, i32) {
    %c0_i32 = arith.constant 0 : i32
    return %arg0, %arg1 : i32, i32
  }
  func.func @transform_1(%arg0: i32, %arg1: i32) -> (i32, i32) {
    %c0_i32 = arith.constant 0 : i32
    return %arg0, %arg1 : i32, i32
  }
}

</mosaic_0001>

<bundles_post_ra>
// kernel: tpu_custom_call.1
= control target key start
LH: loop header
LB: loop body
LE: loop exit
PB: predicated region body
PF: predicated region fallthrough
CT: control target
= control target key end

     0   :  { %6 = vsyncpa [#allocation3], 0  ;;  %s134_s0 = inlined_call_operand.hbm [shape: f32[4,512], index: 0, kind: input, shape index: {}]   ;;  %s135_s1 = inlined_call_operand.hbm [shape: f32[4,512], index: 1, kind: output, shape index: {}]  }
   0x1   :  { %7 = vsyncpa [#allocation4], 0  ;;  %s115_s6 = smov [#allocation2]  }
   0x2   :  { %s14_s7 = sshll.u32 %s115_s6, 4  ;;  %s15_s7 = int_to_ptr.vmem [resolvable:$true] %s14_s7 }
   0x3   :  { %s79_s8 = scalar_lea.vmem %s15_s7, 256  ;;  %p84_p1 = scmp.lt.s32.totalorder %s15_s7, %s15_s7 }
   0x4   :  { %p80_p0 = scmp.ne.s32.totalorder %s15_s7, %s79_s8  ;;  %p85_p2 = scmp.lt.s32.totalorder %s79_s8, %s79_s8 }
   0x6   :  { %p86_p3 = por %p85_p2, %p84_p1 }
   0x8   :  { %p87_p4 = pnand %p86_p3, %p80_p0 }
   0xa   :  { %90 = shalt.err (!%p87_p4)
}
   0xb   :  { %17 = dma.hbm_to_vmem [thread:$0]  %s134_s0, 256, %s15_s7, [#allocation3]  }
   0xc   :  { %111 = dma.done.wait [#allocation3], 256  }
   0xd   :  { %112 = vsyncadd [#allocation3], 4294967040  ;;  %v21_v0 = vld [vmem:[#allocation2] sm:$0xff]  ;;  %v22_v1 = vld [vmem:[#allocation2 + $0x8] sm:$0xff]  ;;  %v116_v10 = vmov 1.0   ;;  %s117_s0 = smov [#allocation5]  }
   0xe   :  { %v23_v2 = vmul.f32 -2.0, %v21_v0  ;;  %v24_v3 = vmul.f32 -2.0, %v22_v1  ;;  %vm35_vm0 = vcmp.lt.f32.partialorder %v21_v0, 0.0  ;;  %vm36_vm1 = vcmp.lt.f32.partialorder %v22_v1, 0.0  ;;  %s51_s11 = sshll.u32 %s117_s0, 4  ;;  %s52_s11 = int_to_ptr.vmem [resolvable:$true] %s51_s11 }
   0xf   :  { %v37_v11 = vsel %vm35_vm0, 0.0, %v116_v10  ;;  %v38_v12 = vsel %vm36_vm1, 0.0, %v116_v10  ;;  %s91_s12 = scalar_lea.vmem %s52_s11, 256  ;;  %p96_p6 = scmp.lt.s32.totalorder %s52_s11, %s52_s11 }
  0x10   :  { %v25_v4 = vmul.f32 1.442695, %v23_v2  ;;  %v27_v5 = vmul.f32 1.442695, %v24_v3  ;;  %p92_p5 = scmp.ne.s32.totalorder %s52_s11, %s91_s12  ;;  %p97_p7 = scmp.lt.s32.totalorder %s91_s12, %s91_s12 }
  0x12   :  { %63 = vpow2.f32 %v25_v4  ;;  %p98_p8 = por %p97_p7, %p96_p6 }
  0x13   :  { %65 = vpow2.f32 %v27_v5 }
  0x14   :  { %p99_p9 = pnand %p98_p8, %p92_p5 }
  0x1f   :  { %v64_v6 = vpop.eup %63 }
  0x20   :  { %v66_v7 = vpop.eup %65  ;;  %v29_v8 = vadd.f32 1.0, %v64_v6 }
  0x21   :  { %v30_v9 = vadd.f32 1.0, %v66_v7 }
  0x22   :  { %67 = vrcp.f32 %v29_v8 }
  0x23   :  { %69 = vrcp.f32 %v30_v9 }
  0x2f   :  { %v68_v13 = vpop.eup %67 }
  0x30   :  { %v70_v14 = vpop.eup %69  ;;  %v39_v15 = vsub.f32 %v37_v11, %v68_v13 }
  0x31   :  { %v40_v16 = vsub.f32 %v38_v12, %v70_v14 }
  0x32   :  { %v41_v17 = vmul.f32 2.0, %v39_v15 }
  0x33   :  { %v42_v18 = vmul.f32 2.0, %v40_v16 }
  0x34   :  { %43 = vst [vmem:[#allocation5] sm:$0xff] %v41_v17 }
  0x35   :  { %44 = vst [vmem:[#allocation5 + $0x8] sm:$0xff] %v42_v18 }
  0x36   :  { %102 = shalt.err (!%p99_p9)
}
  0x37   :  { %54 = dma.vmem_to_hbm [thread:$0]  %s52_s11, 256, %s135_s1, [#allocation4]  }
  0x38   :  { %113 = dma.done.wait [#allocation4], 256  }
  0x39   :  { %114 = vsyncadd [#allocation4], 4294967040 }
  0x3a   :  { %58 = vsyncpa [#allocation3], 1 }
  0x3b   :  { %59 = vsyncpa [#allocation4], 1 }

</bundles_post_ra>
